<compile_context>
chip_gen: v7x
topology: tpu7x:2x2x1
jax: 0.10.0
libtpu: 0.0.40
codegen_flags: <defaults>
</compile_context>

<pallas_src>
import math

import jax
import jax.numpy as jnp
from jax import lax
from jax.experimental import pallas as pl
from jax.experimental.pallas import tpu as pltpu


def _round_up(x: int, m: int) -> int:
    return (x + m - 1) // m * m


def _rbm_kernel(h0_ref, w_ref, vb_ref, hb_ref, uv_ref, uh_ref,
                v_out_ref, h_out_ref, h_carry_ref):
    s = pl.program_id(1)

    # Initialize the carried hidden state from the input on the first Gibbs step.
    @pl.when(s == 0)
    def _():
        h_carry_ref[...] = h0_ref[...].astype(jnp.bfloat16)

    h = h_carry_ref[...]            # (tb, Hp) bf16, binary {0, 1}
    w = w_ref[...]                  # (Hp, Vp) bf16 (resident)

    # --- update_vis: v = bernoulli(sigmoid(h @ W + vis_bias)) -----------------
    vis_z = jnp.dot(h, w, preferred_element_type=jnp.float32) + vb_ref[...]
    v = (uv_ref[0] < jax.nn.sigmoid(vis_z)).astype(jnp.bfloat16)      # (tb, Vp)

    # --- update_hid: h = bernoulli(sigmoid(v @ W.T + hid_bias)) ---------------
    # Contract over the V axis of both operands -> no materialized transpose.
    hid_z = lax.dot_general(
        v, w, dimension_numbers=(((1,), (1,)), ((), ())),
        preferred_element_type=jnp.float32) + hb_ref[...]
    h_new = (uh_ref[0] < jax.nn.sigmoid(hid_z)).astype(jnp.bfloat16)  # (tb, Hp)

    h_carry_ref[...] = h_new

    # Write outputs once per batch block, on the final Gibbs step.
    @pl.when(s == pl.num_programs(1) - 1)
    def _():
        v_out_ref[...] = v.astype(v_out_ref.dtype)
        h_out_ref[...] = h_new.astype(h_out_ref.dtype)


def rbm_forward(state, weights, vis_bias, hid_bias, *, steps: int, key,
                batch_tile: int = 128):
    """Runs `steps` Gibbs updates on state = [v (B,V), h (B,H)]; returns final [v, h]."""
    v0, h0 = state
    B, V = v0.shape
    Bh, H = h0.shape
    assert Bh == B and weights.shape == (H, V)

    if steps <= 0:
        return [v0, h0]

    f32 = jnp.float32

    # Pad feature dims to the 128-lane vreg width; pad batch to a sublane-aligned tile.
    Vp = _round_up(V, 128)
    Hp = _round_up(H, 128)
    tb = min(batch_tile, _round_up(B, 8))
    Bp = _round_up(B, tb)

    w_p = (jnp.zeros((Hp, Vp), f32).at[:H, :V].set(weights.astype(f32))
           .astype(jnp.bfloat16))                                  # single bf16 copy of W
    vb_p = jnp.zeros((1, Vp), f32).at[0, :V].set(vis_bias.astype(f32))
    hb_p = jnp.zeros((1, Hp), f32).at[0, :H].set(hid_bias.astype(f32))
    h0_p = jnp.zeros((Bp, Hp), f32).at[:B, :H].set(h0.astype(f32))
    # (the initial v is never read by forward(): update_vis only depends on h)

    # Uniform randoms for every Bernoulli draw (shape-only dependence -> precomputable).
    k_v, k_h = jax.random.split(key)
    u_v = jax.random.uniform(k_v, (steps, Bp, Vp), f32)
    u_h = jax.random.uniform(k_h, (steps, Bp, Hp), f32)

    grid = (Bp // tb, steps)

    # Rough VMEM budget: double-buffered per-step uniform blocks + resident W/bias/state.
    block_bytes = (
        2 * (tb * Vp + tb * Hp) * 4      # pipelined uniform blocks (x2 buffers)
        + Hp * Vp * 2                    # bf16 weights (resident)
        + (Vp + Hp) * 4                  # biases
        + tb * Hp * 4 + tb * Hp * 2      # h0 block + bf16 carry scratch
        + (tb * Vp + tb * Hp) * 4        # output blocks
    )
    vmem_limit = max(32 << 20, min(100 << 20, 4 * block_bytes))

    v_out, h_out = pl.pallas_call(
        _rbm_kernel,
        out_shape=(jax.ShapeDtypeStruct((Bp, Vp), f32),
                   jax.ShapeDtypeStruct((Bp, Hp), f32)),
        grid_spec=pltpu.PrefetchScalarGridSpec(
            num_scalar_prefetch=0,
            grid=grid,
            in_specs=[
                pl.BlockSpec((tb, Hp), lambda b, s: (b, 0)),        # h0 (read at s==0)
                pl.BlockSpec((Hp, Vp), lambda b, s: (0, 0)),        # W, resident
                pl.BlockSpec((1, Vp), lambda b, s: (0, 0)),         # vis_bias
                pl.BlockSpec((1, Hp), lambda b, s: (0, 0)),         # hid_bias
                pl.BlockSpec((1, tb, Vp), lambda b, s: (s, b, 0)),  # uniforms for v
                pl.BlockSpec((1, tb, Hp), lambda b, s: (s, b, 0)),  # uniforms for h
            ],
            out_specs=(
                pl.BlockSpec((tb, Vp), lambda b, s: (b, 0)),
                pl.BlockSpec((tb, Hp), lambda b, s: (b, 0)),
            ),
            scratch_shapes=[pltpu.VMEM((tb, Hp), jnp.bfloat16)],    # hidden-state carry
        ),
        compiler_params=pltpu.CompilerParams(
            dimension_semantics=("parallel", "arbitrary"),
            vmem_limit_bytes=vmem_limit),
    )(h0_p, w_p, vb_p, hb_p, u_v, u_h)

    return [v_out[:B, :V], h_out[:B, :H]]


def init_rbm_params(key, vis_features: int, hid_features: int):
    """Deterministic parameter init mirroring the PyTorch __init__ distributions."""
    k_vb, k_hb, k_w = jax.random.split(key, 3)
    vb_bound = 1.0 / math.sqrt(hid_features)
    vis_bias = jax.random.uniform(k_vb, (vis_features,), jnp.float32,
                                  minval=-vb_bound, maxval=vb_bound)
    hb_bound = 1.0 / math.sqrt(vis_features)
    hid_bias = jax.random.uniform(k_hb, (hid_features,), jnp.float32,
                                  minval=-hb_bound, maxval=hb_bound)
    # kaiming_uniform(a=sqrt(5)) on (hid, vis): bound = sqrt(6/((1+a^2)*fan_in)) = 1/sqrt(vis)
    w_bound = 1.0 / math.sqrt(vis_features)
    weights = jax.random.uniform(k_w, (hid_features, vis_features), jnp.float32,
                                 minval=-w_bound, maxval=w_bound)
    return weights, vis_bias, hid_bias


if __name__ == "__main__":
    key = jax.random.PRNGKey(0)
    k_params, k_v, k_h, k_gibbs = jax.random.split(key, 4)

    B, V, H = 8, 64, 32
    steps = 4

    weights, vis_bias, hid_bias = init_rbm_params(k_params, V, H)

    # initial state (as produced by init_state with batch_size only: bernoulli(0.5))
    v0 = jax.random.bernoulli(k_v, 0.5, (B, V)).astype(jnp.float32)
    h0 = jax.random.bernoulli(k_h, 0.5, (B, H)).astype(jnp.float32)

    state = rbm_forward([v0, h0], weights, vis_bias, hid_bias,
                        steps=steps, key=k_gibbs)
    state = [jax.block_until_ready(s) for s in state]

    assert state[0].shape == (B, V) and state[1].shape == (B, H)
    assert state[0].dtype == jnp.float32 and state[1].dtype == jnp.float32
    # samples must be binary {0, 1}
    assert bool(jnp.all((state[0] == 0.0) | (state[0] == 1.0)))
    assert bool(jnp.all((state[1] == 0.0) | (state[1] == 1.0)))

    print("KERNEL_OK")
</pallas_src>

<mosaic_0001>
module attributes {stable_mosaic.version = 11 : i64} {
  func.func @_rbm_kernel(%arg0: i32, %arg1: i32, %arg2: memref<8x128xf32, #tpu.memory_space<vmem>>, %arg3: memref<128x128xbf16, #tpu.memory_space<vmem>>, %arg4: memref<1x128xf32, #tpu.memory_space<vmem>>, %arg5: memref<1x128xf32, #tpu.memory_space<vmem>>, %arg6: memref<1x8x128xf32, #tpu.memory_space<vmem>>, %arg7: memref<1x8x128xf32, #tpu.memory_space<vmem>>, %arg8: memref<8x128xf32, #tpu.memory_space<vmem>>, %arg9: memref<8x128xf32, #tpu.memory_space<vmem>>, %arg10: memref<8x128xbf16, #tpu.memory_space<vmem>>) attributes {dimension_semantics = [#tpu.dimension_semantics<parallel>, #tpu.dimension_semantics<arbitrary>], iteration_bounds = array<i64: 1, 4>, scalar_prefetch = 0 : i64, scratch_operands = 1 : i64, tpu.core_type = #tpu.core_type<tc>, window_params = [{transform_indices = @transform_0, window_bounds = array<i64: 8, 128>}, {pipeline_mode = #tpu.pipeline_mode<synchronous>, transform_indices = @transform_1, window_bounds = array<i64: 128, 128>}, {pipeline_mode = #tpu.pipeline_mode<synchronous>, transform_indices = @transform_2, window_bounds = array<i64: 1, 128>}, {pipeline_mode = #tpu.pipeline_mode<synchronous>, transform_indices = @transform_3, window_bounds = array<i64: 1, 128>}, {transform_indices = @transform_4, window_bounds = array<i64: 1, 8, 128>}, {transform_indices = @transform_5, window_bounds = array<i64: 1, 8, 128>}, {transform_indices = @transform_6, window_bounds = array<i64: 8, 128>}, {transform_indices = @transform_7, window_bounds = array<i64: 8, 128>}]} {
    %c0_i32 = arith.constant 0 : i32
    %0 = arith.cmpi eq, %arg1, %c0_i32 : i32
    %1 = arith.extui %0 : i1 to i32
    %c0_i32_0 = arith.constant 0 : i32
    %2 = arith.cmpi ne, %1, %c0_i32_0 : i32
    scf.if %2 {
      %c0_20 = arith.constant 0 : index
      %c0_21 = arith.constant 0 : index
      %39 = vector.load %arg2[%c0_20, %c0_21] : memref<8x128xf32, #tpu.memory_space<vmem>>, vector<8x128xf32>
      %40 = arith.truncf %39 : vector<8x128xf32> to vector<8x128xbf16>
      %c0_22 = arith.constant 0 : index
      %c0_23 = arith.constant 0 : index
      %41 = vector.load %arg10[%c0_22, %c0_23] : memref<8x128xbf16, #tpu.memory_space<vmem>>, vector<8x128xbf16>
      tpu.vector_store %arg10[%c0_22, %c0_23], %40 {strides = array<i32>} : memref<8x128xbf16, #tpu.memory_space<vmem>>, vector<8x128xbf16>,
    } else {
    }
    %c0 = arith.constant 0 : index
    %c0_1 = arith.constant 0 : index
    %3 = vector.load %arg10[%c0, %c0_1] : memref<8x128xbf16, #tpu.memory_space<vmem>>, vector<8x128xbf16>
    %c0_2 = arith.constant 0 : index
    %c0_3 = arith.constant 0 : index
    %4 = vector.load %arg3[%c0_2, %c0_3] : memref<128x128xbf16, #tpu.memory_space<vmem>>, vector<128x128xbf16>
    %cst = arith.constant dense<0.000000e+00> : vector<8x128xf32>
    %5 = tpu.matmul %3, %4, %cst {dimension_numbers = #tpu.dot_dimension_numbers<[1], [0], [0], [1], [0, 0, 1, 1], [], []>} : vector<8x128xbf16>, vector<128x128xbf16>, vector<8x128xf32> -> vector<8x128xf32>
    %c0_4 = arith.constant 0 : index
    %c0_5 = arith.constant 0 : index
    %6 = vector.load %arg4[%c0_4, %c0_5] : memref<1x128xf32, #tpu.memory_space<vmem>>, vector<1x128xf32>
    %7 = vector.broadcast %6 : vector<1x128xf32> to vector<8x128xf32>
    %8 = arith.addf %5, %7 : vector<8x128xf32>
    %c0_6 = arith.constant 0 : index
    %c0_7 = arith.constant 0 : index
    %c0_8 = arith.constant 0 : index
    %9 = vector.load %arg6[%c0_6, %c0_7, %c0_8] : memref<1x8x128xf32, #tpu.memory_space<vmem>>, vector<1x8x128xf32>
    %10 = vector.shape_cast %9 : vector<1x8x128xf32> to vector<8x128xf32>
    %11 = arith.negf %8 : vector<8x128xf32>
    %12 = math.exp %11 : vector<8x128xf32>
    %cst_9 = arith.constant 1.000000e+00 : f32
    %13 = vector.broadcast %cst_9 : f32 to vector<8x128xf32>
    %14 = arith.addf %13, %12 : vector<8x128xf32>
    %15 = arith.divf %13, %14 : vector<8x128xf32>
    %16 = arith.cmpf olt, %10, %15 : vector<8x128xf32>
    %17 = arith.extui %16 : vector<8x128xi1> to vector<8x128xi32>
    %18 = arith.sitofp %17 : vector<8x128xi32> to vector<8x128xf32>
    %19 = arith.truncf %18 : vector<8x128xf32> to vector<8x128xbf16>
    %cst_10 = arith.constant dense<0.000000e+00> : vector<8x128xf32>
    %20 = tpu.matmul %19, %4, %cst_10 {dimension_numbers = #tpu.dot_dimension_numbers<[1], [1], [0], [0], [0, 0, 1, 0], [], []>} : vector<8x128xbf16>, vector<128x128xbf16>, vector<8x128xf32> -> vector<8x128xf32>
    %c0_11 = arith.constant 0 : index
    %c0_12 = arith.constant 0 : index
    %21 = vector.load %arg5[%c0_11, %c0_12] : memref<1x128xf32, #tpu.memory_space<vmem>>, vector<1x128xf32>
    %22 = vector.broadcast %21 : vector<1x128xf32> to vector<8x128xf32>
    %23 = arith.addf %20, %22 : vector<8x128xf32>
    %c0_13 = arith.constant 0 : index
    %c0_14 = arith.constant 0 : index
    %c0_15 = arith.constant 0 : index
    %24 = vector.load %arg7[%c0_13, %c0_14, %c0_15] : memref<1x8x128xf32, #tpu.memory_space<vmem>>, vector<1x8x128xf32>
    %25 = vector.shape_cast %24 : vector<1x8x128xf32> to vector<8x128xf32>
    %26 = arith.negf %23 : vector<8x128xf32>
    %27 = math.exp %26 : vector<8x128xf32>
    %cst_16 = arith.constant 1.000000e+00 : f32
    %28 = vector.broadcast %cst_16 : f32 to vector<8x128xf32>
    %29 = arith.addf %28, %27 : vector<8x128xf32>
    %30 = arith.divf %28, %29 : vector<8x128xf32>
    %31 = arith.cmpf olt, %25, %30 : vector<8x128xf32>
    %32 = arith.extui %31 : vector<8x128xi1> to vector<8x128xi32>
    %33 = arith.sitofp %32 : vector<8x128xi32> to vector<8x128xf32>
    %34 = arith.truncf %33 : vector<8x128xf32> to vector<8x128xbf16>
    %c0_17 = arith.constant 0 : index
    %c0_18 = arith.constant 0 : index
    %35 = vector.load %arg10[%c0_17, %c0_18] : memref<8x128xbf16, #tpu.memory_space<vmem>>, vector<8x128xbf16>
    tpu.vector_store %arg10[%c0_17, %c0_18], %34 {strides = array<i32>} : memref<8x128xbf16, #tpu.memory_space<vmem>>, vector<8x128xbf16>,
    %c3_i32 = arith.constant 3 : i32
    %36 = arith.cmpi eq, %arg1, %c3_i32 : i32
    %37 = arith.extui %36 : i1 to i32
    %c0_i32_19 = arith.constant 0 : i32
    %38 = arith.cmpi ne, %37, %c0_i32_19 : i32
    scf.if %38 {
      %39 = arith.extf %19 : vector<8x128xbf16> to vector<8x128xf32>
      %c0_20 = arith.constant 0 : index
      %c0_21 = arith.constant 0 : index
      %40 = vector.load %arg8[%c0_20, %c0_21] : memref<8x128xf32, #tpu.memory_space<vmem>>, vector<8x128xf32>
      tpu.vector_store %arg8[%c0_20, %c0_21], %39 {strides = array<i32>} : memref<8x128xf32, #tpu.memory_space<vmem>>, vector<8x128xf32>,
      %41 = arith.extf %34 : vector<8x128xbf16> to vector<8x128xf32>
      %c0_22 = arith.constant 0 : index
      %c0_23 = arith.constant 0 : index
      %42 = vector.load %arg9[%c0_22, %c0_23] : memref<8x128xf32, #tpu.memory_space<vmem>>, vector<8x128xf32>
      tpu.vector_store %arg9[%c0_22, %c0_23], %41 {strides = array<i32>} : memref<8x128xf32, #tpu.memory_space<vmem>>, vector<8x128xf32>,
    } else {
    }
    return
  }
  func.func @transform_0(%arg0: i32, %arg1: i32) -> (i32, i32) {
    %c0_i32 = arith.constant 0 : i32
    %c0_i32_0 = arith.constant 0 : i32
    return %arg0, %c0_i32 : i32, i32
  }
  func.func @transform_1(%arg0: i32, %arg1: i32) -> (i32, i32) {
    %c0_i32 = arith.constant 0 : i32
    %c0_i32_0 = arith.constant 0 : i32
    %c0_i32_1 = arith.constant 0 : i32
    return %c0_i32, %c0_i32_0 : i32, i32
  }
  func.func @transform_2(%arg0: i32, %arg1: i32) -> (i32, i32) {
    %c0_i32 = arith.constant 0 : i32
    %c0_i32_0 = arith.constant 0 : i32
    %c0_i32_1 = arith.constant 0 : i32
    return %c0_i32, %c0_i32_0 : i32, i32
  }
  func.func @transform_3(%arg0: i32, %arg1: i32) -> (i32, i32) {
    %c0_i32 = arith.constant 0 : i32
    %c0_i32_0 = arith.constant 0 : i32
    %c0_i32_1 = arith.constant 0 : i32
    return %c0_i32, %c0_i32_0 : i32, i32
  }
  func.func @transform_4(%arg0: i32, %arg1: i32) -> (i32, i32, i32) {
    %c0_i32 = arith.constant 0 : i32
    %c0_i32_0 = arith.constant 0 : i32
    return %arg1, %arg0, %c0_i32 : i32, i32, i32
  }
  func.func @transform_5(%arg0: i32, %arg1: i32) -> (i32, i32, i32) {
    %c0_i32 = arith.constant 0 : i32
    %c0_i32_0 = arith.constant 0 : i32
    return %arg1, %arg0, %c0_i32 : i32, i32, i32
  }
  func.func @transform_6(%arg0: i32, %arg1: i32) -> (i32, i32) {
    %c0_i32 = arith.constant 0 : i32
    %c0_i32_0 = arith.constant 0 : i32
    return %arg0, %c0_i32 : i32, i32
  }
  func.func @transform_7(%arg0: i32, %arg1: i32) -> (i32, i32) {
    %c0_i32 = arith.constant 0 : i32
    %c0_i32_0 = arith.constant 0 : i32
    return %arg0, %c0_i32 : i32, i32
  }
}

</mosaic_0001>

<bundles_post_ra>
// kernel: tpu_custom_call.1
= control target key start
LH: loop header
LB: loop body
LE: loop exit
PB: predicated region body
PF: predicated region fallthrough
CT: control target
= control target key end

     0   :  { %s1527_s0 = inlined_call_operand.hbm [shape: f32[8,128], index: 0, kind: input, shape index: {}]   ;;  %s1528_s1 = inlined_call_operand.hbm [shape: bf16[128,128], index: 1, kind: input, shape index: {}]   ;;  %s1529_s2 = inlined_call_operand.vmem [shape: f32[1,128], index: 2, kind: input, shape index: {}]   ;;  %s1530_s3 = inlined_call_operand.vmem [shape: f32[1,128], index: 3, kind: input, shape index: {}]   ;;  %s1531_s4 = inlined_call_operand.hbm [shape: f32[4,8,128], index: 4, kind: input, shape index: {}]   ;;  %s1532_s5 = inlined_call_operand.hbm [shape: f32[4,8,128], index: 5, kind: input, shape index: {}]   ;;  %s1533_s6 = inlined_call_operand.hbm [shape: f32[8,128], index: 6, kind: output, shape index: {0}]   ;;  %s1534_s7 = inlined_call_operand.hbm [shape: f32[8,128], index: 7, kind: output, shape index: {1}]  }
   0x1   :  { %1544 = sst [smem:[#allocation19_spill]] %s1527_s0 }
   0x2   :  { %1545 = sst [smem:[#allocation20_spill]] %s1531_s4 }
   0x3   :  { %13 = vsyncpa [#allocation4], 0 }
   0x4   :  { %14 = vsyncpa [#allocation7], 0 }
   0x5   :  { %15 = vsyncpa [#allocation5], 0 }
   0x6   :  { %16 = vsyncpa [#allocation12], 0  ;;  %s1211_s24 = smov 0   ;;  %s1213_s25 = smov 0  }
   0x7   :  { %s1215_s26 = smov 0   ;;  %s1217_s27 = smov 0  }
   0x8   :  { %s1219_s28 = smov 0   ;;  %s1221_s29 = smov 0  }
   0x9 LB: > { %s1240_s30 = sadd.s32 4294967295, %s1158_s29   ;;  %p145_p0 = scmp.ne.s32.totalorder %s1142_s25, %s1138_s24  ;;  %s1158_s29 = sphi %s1221_s29, %s22_s29   ;;  %s1154_s28 = sphi %s1219_s28, %s1572_s28   ;;  %s1150_s27 = sphi %s1217_s27, %s1571_s27   ;;  %s1146_s26 = sphi %s1215_s26, %s1570_s26   ;;  %s1142_s25 = sphi %s1213_s25, %s1569_s25   ;;  %s1138_s24 = sphi %s1211_s24, %s1568_s24  }
   0xa   : > { %p1535_p1 = scmp.eq.s32.totalorder %s1240_s30, 0  ;;  %p713_p2 = scmp.ge.s32.totalorder %s1158_s29, 1 }
   0xb   : > { %p236_p3 = scmp.lt.s32.totalorder %s1158_s29, 5  ;;  %s1160_s10 = smov [#allocation3]  }
   0xc   : > { %p1248_p4 = por %p1535_p1, %p145_p0  ;;  %s251_s11 = sshll.u32 %s1160_s10, 4  ;;  %s252_s11 = int_to_ptr.vmem [resolvable:$true] %s251_s11 }
   0xd   : > { %p1252_p5 = pnand %p713_p2, %p236_p3  ;;  %s31_s13 = sadd.s32 1, %s1154_s28 }
   0xe   : > { %s1546_s8 = scalar_select %p1248_p4, 1, 0 }
   0xf   : > { %s1547_s9 = scalar_select %p1252_p5, 1, 0 }
  0x10   : > { %p828_p6 = pneg %p1252_p5  ;;  %s132_s14 = sadd.s32 1, %s1146_s26 }
  0x11   : > { %p1266_p8 = scmp.ge.s32.totalorder %s31_s13, 4  ;;  %s1550_s0 = sld [smem:[#allocation19_spill]] }
  0x12   : > { %p1260_p7 = pnand %p828_p6, %p1535_p1 }
  0x13   : > { %s1549_s15 = scalar_select %p1266_p8, 1, 0 }
  0x14   : > { %p1540_p10 = pneg %p1260_p7 }
  0x17   : > { %s924_s18 = scalar_lea.hbm %s1550_s0, 128 }
  0x18   : > { %p925_p9 = scmp.ne.s32.totalorder %s1550_s0, %s924_s18  ;;  %p931_p13 = scmp.lt.u32.totalorder %s924_s18, %s1550_s0 }
  0x1a   : > { %p927_p11 = pnand %p1540_p10, %p925_p9 }
  0x1c   : > { %p928_p12 = pneg %p927_p11 }
  0x1e   : > { %p933_p0 = pnand %p931_p13, %p928_p12 }
  0x20   : > { %936 = shalt.err (!%p933_p0)
}
  0x21   : > { %s937_s23 = scalar_lea.vmem %s252_s11, 128  ;;  %p945_p1 = scmp.lt.s32.totalorder %s252_s11, %s252_s11 }
  0x22   : > { %p938_p2 = scmp.ne.s32.totalorder %s252_s11, %s937_s23  ;;  %p946_p4 = scmp.lt.s32.totalorder %s937_s23, %s937_s23 }
  0x24   : > { %p940_p3 = pnand %p938_p2, %p1540_p10  ;;  %p947_p5 = por %p946_p4, %p945_p1 }
  0x26   : > { %p941_p6 = pneg %p940_p3 }
  0x28   : > { %p948_p8 = pnand %p947_p5, %p941_p6 }
  0x2a   : > { %951 = shalt.err (!%p948_p8)
}
  0x2b   : > { %831 = dma.hbm_to_vmem [thread:$0]  (!%p1260_p7), %s1550_s0, 128, %s252_s11, [#allocation4]  }
  0x2c   : > { %p1551_p1 = scmp.ne.s32.totalorder %s1549_s15, 0  ;;  %p139_p4 = scmp.ne.s32.totalorder %s1146_s26, %s1142_s25 }
  0x2d   : > { %p140_p5 = scmp.eq.s32.totalorder %s1158_s29, 0  ;;  %p844_p8 = scmp.lt.s32.totalorder %s1158_s29, 4 }
  0x2e   : > { %s1574_s13 = smov (%p1551_p1, %s31_s13), 0  ;;  %s281_s17 = sand.u32 1, %s1158_s29  }
  0x2f   : > { %1552 = sst [smem:[#allocation18_spill]] %s1574_s13  ;;  %s127_s16 = ssub.s32 %s1154_s28, %s1574_s13 }
  0x30   : > { %p130_p9 = scmp.eq.s32.totalorder %s127_s16, 0  ;;  %p141_p11 = por %p140_p5, %p139_p4 }
  0x31   : > { %s283_s18 = sand.u32 1, %s1146_s26   ;;  %s1538_s21 = sshll.u32 %s1154_s28, 7 }
  0x32   : > { %s1307_s19 = scalar_select %p130_p9, %s1146_s26, %s132_s14  }
  0x33   : > { %s1309_s20 = sshll.u32 %s283_s18, 3  ;;  %s1553_s4 = sld [smem:[#allocation20_spill]] }
  0x34   : > { %s285_s23 = scalar_lea.vmem [#allocation8], %s1309_s20  ;;  %p1322_p12 = pnand %p844_p8, %p141_p11 }
  0x35   : > { %s293_s24 = sshll.u32 %s285_s23, 4  ;;  %s1161_s10 = smov [#allocation6]   ;;  %s1320_s24 = int_to_ptr.vmem [resolvable:$true] %s293_s24 }
  0x36   : > { %s1554_s14 = scalar_select %p1322_p12, 1, 0 }
  0x37   : > { %s1326_s16 = sshll.u32 %s1161_s10, 4  ;;  %s1328_s18 = scalar_lea.sflag [#allocation4], %s281_s17  ;;  %s262_s16 = int_to_ptr.vmem [resolvable:$true] %s1326_s16 }
  0x38   : > { %p1541_p0 = pneg %p1322_p12 }
  0x39   : > { %s1317_s22 = scalar_lea.hbm %s1553_s4, %s1538_s21  ;;  %s957_s21 = scalar_lea.hbm %s1553_s4, 512 }
  0x3a   : > { %s952_s11 = scalar_lea.hbm %s1317_s22, 128  ;;  %p958_p6 = scmp.lt.u32.totalorder %s1317_s22, %s1553_s4 }
  0x3b   : > { %p953_p13 = scmp.ne.s32.totalorder %s1317_s22, %s952_s11  ;;  %p959_p1 = scmp.lt.u32.totalorder %s957_s21, %s952_s11 }
  0x3c   : > { %p961_p5 = scmp.lt.u32.totalorder %s952_s11, %s1317_s22 }
  0x3d   : > { %p955_p2 = pnand %p1541_p0, %p953_p13  ;;  %p960_p4 = por %p959_p1, %p958_p6 }
  0x3f   : > { %p956_p3 = pneg %p955_p2  ;;  %p962_p8 = por %p961_p5, %p960_p4 }
  0x41   : > { %p963_p9 = pnand %p962_p8, %p956_p3 }
  0x43   : > { %966 = shalt.err (!%p963_p9)
}
  0x44   : > { %s967_s17 = scalar_lea.vmem %s1320_s24, 128  ;;  %s1162_s10 = smov [#allocation8]  }
  0x45   : > { %p968_p11 = scmp.ne.s32.totalorder %s1320_s24, %s967_s17  ;;  %s972_s15 = sshll.u32 %s1162_s10, 4  ;;  %s973_s15 = int_to_ptr.vmem [resolvable:$false] %s972_s15 }
  0x46   : > { %s974_s0 = scalar_lea.vmem %s973_s15, 256  ;;  %p975_p10 = scmp.lt.s32.totalorder %s1320_s24, %s973_s15 }
  0x47   : > { %p970_p13 = pnand %p968_p11, %p1541_p0  ;;  %p976_p6 = scmp.lt.s32.totalorder %s974_s0, %s967_s17 }
  0x49   : > { %p971_p2 = pneg %p970_p13  ;;  %p977_p1 = por %p976_p6, %p975_p10 }
  0x4b   : > { %p978_p4 = pnand %p977_p1, %p971_p2 }
  0x4d   : > { %981 = shalt.err (!%p978_p4)
}
  0x4e   : > { %838 = dma.hbm_to_vmem [thread:$0]  (!%p1322_p12), %s1317_s22, 128, %s1320_s24, %s1328_s18  }
  0x4f   : > { %s982_s11 = scalar_lea.hbm %s1528_s1, 1024  ;;  %p1555_p10 = pneg %p1260_p7 }
  0x50   : > { %p983_p3 = scmp.ne.s32.totalorder %s1528_s1, %s982_s11  ;;  %p989_p9 = scmp.lt.u32.totalorder %s982_s11, %s1528_s1 }
  0x52   : > { %p985_p5 = pnand %p983_p3, %p1555_p10 }
  0x54   : > { %p986_p8 = pneg %p985_p5 }
  0x56   : > { %p991_p11 = pnand %p989_p9, %p986_p8 }
  0x58   : > { %994 = shalt.err (!%p991_p11)
}
  0x59   : > { %s995_s22 = scalar_lea.vmem %s262_s16, 1024  ;;  %p1556_p2 = pmov %p1555_p10 }
  0x5a   : > { %p996_p13 = scmp.ne.s32.totalorder %s262_s16, %s995_s22  ;;  %p1003_p4 = scmp.lt.s32.totalorder %s262_s16, %s262_s16 }
  0x5b   : > { %p1004_p0 = scmp.lt.s32.totalorder %s995_s22, %s995_s22 }
  0x5c   : > { %p998_p6 = pnand %p996_p13, %p1556_p2 }
  0x5d   : > { %p1005_p12 = por %p1004_p0, %p1003_p4 }
  0x5e   : > { %p999_p1 = pneg %p998_p6 }
  0x60   : > { %p1006_p3 = pnand %p1005_p12, %p999_p1 }
  0x62   : > { %1009 = shalt.err (!%p1006_p3)
}
  0x63   : > { %s1163_s24 = smov 64   ;;  %s1164_s0 = smov 4  }
  0x64   : > { %834 = dma.hbm_to_vmem [thread:$0]  (!%p1260_p7), %s1528_s1, 1024, %s262_s16, [#allocation7], %s1163_s24, %s1163_s24, %s1164_s0  }
  0x65   : > { %s1557_s11 = sshll.u32 %s1154_s28, 7  ;;  %s304_s15 = scalar_lea.vmem [#allocation9], %s1309_s20 }
  0x66   : > { %s1382_s17 = scalar_lea.hbm %s1532_s5, %s1557_s11  ;;  %s312_s22 = sshll.u32 %s304_s15, 4  ;;  %s313_s22 = int_to_ptr.vmem [resolvable:$true] %s312_s22 }
  0x67   : > { %s1010_s4 = scalar_lea.hbm %s1382_s17, 128  ;;  %p1558_p0 = scmp.ne.s32.totalorder %s1554_s14, 0 }
  0x68   : > { %p1011_p12 = scmp.ne.s32.totalorder %s1382_s17, %s1010_s4  ;;  %s1015_s24 = scalar_lea.hbm %s1532_s5, 512 }
  0x69   : > { %p1559_p10 = pneg %p1558_p0  ;;  %p1016_p7 = scmp.lt.u32.totalorder %s1382_s17, %s1532_s5 }
  0x6a   : > { %p1017_p9 = scmp.lt.u32.totalorder %s1015_s24, %s1010_s4  ;;  %p1019_p13 = scmp.lt.u32.totalorder %s1010_s4, %s1382_s17 }
  0x6b   : > { %p1013_p5 = pnand %p1011_p12, %p1559_p10 }
  0x6c   : > { %p1018_p11 = por %p1017_p9, %p1016_p7 }
  0x6d   : > { %p1014_p8 = pneg %p1013_p5 }
  0x6e   : > { %p1020_p2 = por %p1019_p13, %p1018_p11 }
  0x70   : > { %p1021_p6 = pnand %p1020_p2, %p1014_p8 }
  0x72   : > { %1024 = shalt.err (!%p1021_p6)
}
  0x73   : > { %s1025_s20 = scalar_lea.vmem %s313_s22, 128  ;;  %p1560_p4 = pmov %p1559_p10 }
  0x74   : > { %p1026_p1 = scmp.ne.s32.totalorder %s313_s22, %s1025_s20  ;;  %s1165_s21 = smov [#allocation9]  }
  0x75   : > { %s1030_s11 = sshll.u32 %s1165_s21, 4  ;;  %s1031_s11 = int_to_ptr.vmem [resolvable:$false] %s1030_s11 }
  0x76   : > { %p1028_p3 = pnand %p1026_p1, %p1560_p4  ;;  %s1032_s23 = scalar_lea.vmem %s1031_s11, 256 }
  0x77   : > { %p1033_p10 = scmp.lt.s32.totalorder %s313_s22, %s1031_s11  ;;  %p1034_p5 = scmp.lt.s32.totalorder %s1032_s23, %s1025_s20 }
  0x78   : > { %p1029_p12 = pneg %p1028_p3 }
  0x79   : > { %p1035_p7 = por %p1034_p5, %p1033_p10 }
  0x7b   : > { %p1036_p9 = pnand %p1035_p7, %p1029_p12 }
  0x7d   : > { %1039 = shalt.err (!%p1036_p9)
}
  0x7e   : > { %841 = dma.hbm_to_vmem [thread:$0]  (!%p1558_p0), %s1382_s17, 128, %s313_s22, %s1328_s18  }
  0x7f   : > { %p1561_p8 = scmp.ne.s32.totalorder %s1547_s9, 0 }
  0x80   : > { %p1562_p11 = scmp.eq.s32.totalorder (!%p1561_p8), %s1240_s30, 0 }
  0x81   : > { %321 = sbr.rel (%p1561_p8) target bundleno = 722 (0x2d2), region = 44 }
  0x88   : > { %1117 = dma.done.wait (%p1562_p11), [#allocation4], 128   ;;  %p1563_p13 = pmov %p1562_p11 }
  0x89   : > { %p1564_p2 = pmov %p1562_p11 }
  0x8a   : > { %1119 = vsyncadd (%p1563_p13), [#allocation4], 4294967168 }
  0x8b   : > { %1121 = dma.done.wait (%p1564_p2), [#allocation7], 1024   ;;  %p1565_p6 = pmov %p1564_p2 }
  0x8c   : > { %s331_s4 = sand.u32 1, %s1240_s30   ;;  %s333_s14 = sand.u32 1, %s1142_s25  }
  0x8d   : > { %1123 = vsyncadd (%p1565_p6), [#allocation7], 4294966272  ;;  %s1417_s18 = sshll.u32 %s333_s14, 3  ;;  %s332_s9 = scalar_lea.sflag [#allocation4], %s331_s4 }
  0x8e   : > { %s335_s10 = scalar_lea.vmem [#allocation8], %s1417_s18  ;;  %p1566_p0 = scmp.ne.s32.totalorder %s1546_s8, 0 }
  0x90   : > { %1125 = dma.done.wait (%p1566_p0), %s332_s9, 256  }
  0x91   : > { %1127 = vsyncadd (%p1566_p0), %s332_s9, 4294967040  ;;  %s344_s17 = scalar_lea.vmem [#allocation9], %s1417_s18  ;;  %p726_p1 = scmp.ne.s32.totalorder %s1150_s27, 0 }
  0x92   : > { %v380_v0 = vld [vmem:[#allocation3] sm:$0xff] (!%p726_p1) }
  0x93   : > { %379 = sbr.rel (%p726_p1) target bundleno = 154 (0x9a), region = 64  ;;  %v381_v1 = vpack.c.bf16 (!%p726_p1), %v380_v0, %v380_v0 }
  0x95   : > { %382 = vst [vmem:[#allocation2] sm:$0xf] (!%p726_p1), %v381_v1 }
  0x9a PF: > { %v908_v2 = vld [vmem:[#allocation6] sm:$0xff]   ;;  %v1166_v3 = vmov 0.0   ;;  %v909_v4 = vld [vmem:[#allocation6 + $0x8] sm:$0xff]   ;;  %vm1167_vm0 = vmmov 0   ;;  %v910_v5 = vld [vmem:[#allocation6 + $0x10] sm:$0xff]   ;;  %p743_p4 = scmp.ne.s32.totalorder %s1150_s27, 3 }
  0x9b   : > { %768 = vmatprep.subr.bf16.mxu0 %v1166_v3  ;;  %788 = vmatprep.subr.bf16.mxu1 %v1166_v3  ;;  %v911_v6 = vld [vmem:[#allocation6 + $0x18] sm:$0xff]   ;;  %v912_v7 = vld [vmem:[#allocation6 + $0x20] sm:$0xff]   ;;  %v913_v8 = vld [vmem:[#allocation6 + $0x28] sm:$0xff]   ;;  %v1168_v24 = vmov 1.0|1.0  }
  0x9c   : > { %769 = vmatpush3.bf16.msra.mxu0 %v908_v2  ;;  %784 = vmatprep.mubr.msk.bf16.mxu0 %vm1167_vm0, %v1166_v3  ;;  %v914_v9 = vld [vmem:[#allocation6 + $0x30] sm:$0xff]   ;;  %v915_v10 = vld [vmem:[#allocation6 + $0x38] sm:$0xff]   ;;  %v495_v21 = vld [vmem:[%s335_s10] sm:$0xff] }
  0x9d   : > { %770 = vmatprep.subr.bf16.mxu0 %v1166_v3  ;;  %789 = vmatpush3.bf16.xpose.msra.mxu1 %v908_v2  ;;  %v383_v11 = vld [vmem:[#allocation2] sm:$0xf] }
  0x9e   : > { %790 = vmatprep.subr.bf16.mxu1 %v1166_v3  ;;  %804 = vmatprep.mubr.msk.bf16.mxu1 %vm1167_vm0, %v1166_v3  ;;  %v727_v12 = vld [vmem:[%s1529_s2] ss:$0 sm:$0xff] }
  0x9f   : > { %v738_v25 = vld [vmem:[%s1530_s3] ss:$0 sm:$0xff] }
  0xa0   : > { %771 = vmatpush3.bf16.msra.mxu0 %v909_v4  ;;  %v553_v34 = vld [vmem:[%s344_s17] sm:$0xff] }
  0xa1   : > { %772 = vmatprep.subr.bf16.mxu0 %v1166_v3 }
  0xa4   : > { %773 = vmatpush3.bf16.msra.mxu0 %v910_v5 }
  0xa5   : > { %774 = vmatprep.subr.bf16.mxu0 %v1166_v3  ;;  %791 = vmatpush3.bf16.xpose.msra.mxu1 %v909_v4 }
  0xa6   : > { %792 = vmatprep.subr.bf16.mxu1 %v1166_v3 }
  0xa8   : > { %775 = vmatpush3.bf16.msra.mxu0 %v911_v6 }
  0xa9   : > { %776 = vmatprep.subr.bf16.mxu0 %v1166_v3 }
  0xac   : > { %777 = vmatpush3.bf16.msra.mxu0 %v912_v7 }
  0xad   : > { %778 = vmatprep.subr.bf16.mxu0 %v1166_v3  ;;  %793 = vmatpush3.bf16.xpose.msra.mxu1 %v910_v5 }
  0xae   : > { %794 = vmatprep.subr.bf16.mxu1 %v1166_v3 }
  0xb0   : > { %779 = vmatpush3.bf16.msra.mxu0 %v913_v8 }
  0xb1   : > { %780 = vmatprep.subr.bf16.mxu0 %v1166_v3 }
  0xb4   : > { %781 = vmatpush3.bf16.msra.mxu0 %v914_v9 }
  0xb5   : > { %782 = vmatprep.subr.bf16.mxu0 %v1166_v3  ;;  %795 = vmatpush3.bf16.xpose.msra.mxu1 %v911_v6 }
  0xb6   : > { %796 = vmatprep.subr.bf16.mxu1 %v1166_v3 }
  0xb8   : > { %783 = vmatpush3.bf16.msra.mxu0 %v915_v10 }
  0xbb   : > { %785 = vmatmul.mubr.bf16.vlgmr.msra.gmra.mrb[0].mxu0 %v383_v11 }
  0xbd   : > { %797 = vmatpush3.bf16.xpose.msra.mxu1 %v912_v7 }
  0xbe   : > { %798 = vmatprep.subr.bf16.mxu1 %v1166_v3 }
  0xc5   : > { %799 = vmatpush3.bf16.xpose.msra.mxu1 %v913_v8 }
  0xc6   : > { %800 = vmatprep.subr.bf16.mxu1 %v1166_v3 }
  0xcd   : > { %801 = vmatpush3.bf16.xpose.msra.mxu1 %v914_v9 }
  0xce   : > { %802 = vmatprep.subr.bf16.mxu1 %v1166_v3 }
  0xd5   : > { %803 = vmatpush3.bf16.xpose.msra.mxu1 %v915_v10 }
 0x18e   : > { %v489_v13 = vpop.f32.mrb[0].mxu0 }
 0x18f   : > { %v490_v14 = vadd.f32 %v727_v12, %v489_v13  ;;  %v786_v15 = vpop.f32.mrb[1].mxu0 }
 0x190   : > { %v492_v16 = vpop.f32.mrb[2].mxu0 }
 0x191   : > { %v736_v17 = vmul.f32 -1.442695, %v490_v14  ;;  %v787_v18 = vpop.f32.mrb[3].mxu0 }
 0x193   : > { %916 = vpow2.f32 %v736_v17 }
 0x19d   : > { %v917_v19 = vpop.eup %916 }
 0x19e   : > { %v499_v20 = vadd.f32 1.0, %v917_v19 }
 0x1a0   : > { %918 = vrcp.f32 %v499_v20 }
 0x1aa   : > { %v919_v22 = vpop.eup %918 }
 0x1ab   : > { %vm502_vm1 = vcmp.lt.f32.partialorder %v495_v21, %v919_v22 }
 0x1ac   : > { %v737_v23 = vsel %vm502_vm1, 1.0, %v1166_v3  ;;  %vm739_vm2 = vmpackc.low %vm502_vm1, %vm502_vm1 }
 0x1ad   : > { %805 = vmatmul.mubr.msk.bf16.vlgmr.msra.gmra.mrb[0].mxu1 %vm739_vm2, %v1168_v24  ;;  %570 = vst [vmem:[#allocation10] sm:$0xff] (!%p743_p4), %v737_v23 }
 0x280   : > { %v547_v26 = vpop.f32.mrb[0].mxu1 }
 0x281   : > { %v548_v27 = vadd.f32 %v738_v25, %v547_v26  ;;  %v806_v28 = vpop.f32.mrb[1].mxu1 }
 0x282   : > { %v550_v29 = vpop.f32.mrb[2].mxu1 }
 0x283   : > { %v741_v30 = vmul.f32 -1.442695, %v548_v27  ;;  %v807_v31 = vpop.f32.mrb[3].mxu1 }
 0x285   : > { %920 = vpow2.f32 %v741_v30 }
 0x28f   : > { %v921_v32 = vpop.eup %920 }
 0x290   : > { %v557_v33 = vadd.f32 1.0, %v921_v32 }
 0x292   : > { %922 = vrcp.f32 %v557_v33 }
 0x29b   : > { %568 = sbr.rel (%p743_p4) target bundleno = 674 (0x2a2), region = 68 }
 0x29c   : > { %v923_v35 = vpop.eup %922 }
 0x29d   : > { %vm560_vm3 = vcmp.lt.f32.partialorder %v553_v34, %v923_v35 }
 0x29e   : > { %v742_v36 = vsel %vm560_vm3, 1.0, %v1166_v3 }
 0x29f   : > { %v563_v37 = vpack.c.bf16 %v742_v36, %v742_v36  ;;  %572 = vst [vmem:[#allocation11] sm:$0xff] (!%p743_p4), %v742_v36 }
 0x2a1   : > { %564 = vst [vmem:[#allocation2] sm:$0xf] %v563_v37 }
 0x2a2 PF: > { %p847_p3 = scmp.eq.s32.totalorder %s1240_s30, 3  ;;  %s1169_s16 = smov [#allocation10]  }
 0x2a3   : > { %s582_s24 = sshll.u32 %s1169_s16, 4  ;;  %s1170_s0 = smov [#allocation11]   ;;  %s583_s24 = int_to_ptr.vmem [resolvable:$true] %s582_s24 }
 0x2a4   : > { %s595_s13 = sshll.u32 %s1170_s0, 4  ;;  %s1040_s20 = scalar_lea.vmem %s583_s24, 128  ;;  %s1458_s13 = int_to_ptr.vmem [resolvable:$true] %s595_s13 }
 0x2a5   : > { %p1041_p12 = scmp.ne.s32.totalorder %s583_s24, %s1040_s20  ;;  %p1047_p7 = scmp.lt.s32.totalorder %s583_s24, %s583_s24 }
 0x2a6   : > { %p1048_p9 = scmp.lt.s32.totalorder %s1040_s20, %s1040_s20 }
 0x2a7   : > { %p1042_p10 = pnand %p1041_p12, %p847_p3 }
 0x2a8   : > { %p1049_p8 = por %p1048_p9, %p1047_p7 }
 0x2a9   : > { %p1043_p5 = pneg %p1042_p10 }
 0x2ab   : > { %p1050_p11 = pnand %p1049_p8, %p1043_p5 }
 0x2ad   : > { %1053 = shalt.err (!%p1050_p11)
}
 0x2ae   : > { %s1054_s11 = scalar_lea.hbm %s1533_s6, 128 }
 0x2af   : > { %p1055_p13 = scmp.ne.s32.totalorder %s1533_s6, %s1054_s11  ;;  %p1060_p0 = scmp.lt.u32.totalorder %s1054_s11, %s1533_s6 }
 0x2b1   : > { %p1056_p2 = pnand %p1055_p13, %p847_p3 }
 0x2b3   : > { %p1057_p6 = pneg %p1056_p2 }
 0x2b5   : > { %p1062_p1 = pnand %p1060_p0, %p1057_p6 }
 0x2b7   : > { %1065 = shalt.err (!%p1062_p1)
}
 0x2b8   : > { %821 = dma.vmem_to_hbm [thread:$0]  (%p847_p3), %s583_s24, 128, %s1533_s6, [#allocation5]  }
 0x2b9   : > { %s1066_s17 = scalar_lea.vmem %s1458_s13, 128  ;;  %p1073_p5 = scmp.lt.s32.totalorder %s1458_s13, %s1458_s13 }
 0x2ba   : > { %p1067_p4 = scmp.ne.s32.totalorder %s1458_s13, %s1066_s17  ;;  %p1074_p7 = scmp.lt.s32.totalorder %s1066_s17, %s1066_s17 }
 0x2bc   : > { %p1068_p12 = pnand %p1067_p4, %p847_p3  ;;  %p1075_p9 = por %p1074_p7, %p1073_p5 }
 0x2be   : > { %p1069_p10 = pneg %p1068_p12 }
 0x2c0   : > { %p1076_p8 = pnand %p1075_p9, %p1069_p10 }
 0x2c2   : > { %1079 = shalt.err (!%p1076_p8)
}
 0x2c3   : > { %s1080_s22 = scalar_lea.hbm %s1534_s7, 128 }
 0x2c4   : > { %p1081_p11 = scmp.ne.s32.totalorder %s1534_s7, %s1080_s22  ;;  %p1086_p6 = scmp.lt.u32.totalorder %s1080_s22, %s1534_s7 }
 0x2c6   : > { %p1082_p13 = pnand %p1081_p11, %p847_p3 }
 0x2c8   : > { %p1083_p2 = pneg %p1082_p13 }
 0x2ca   : > { %p1088_p0 = pnand %p1086_p6, %p1083_p2 }
 0x2cc   : > { %1091 = shalt.err (!%p1088_p0)
}
 0x2cd   : > { %823 = dma.vmem_to_hbm [thread:$0]  (%p847_p3), %s1458_s13, 128, %s1534_s7, [#allocation12]  }
 0x2ce   : > { %1129 = dma.done.wait (%p847_p3), [#allocation5], 128  }
 0x2cf   : > { %1131 = vsyncadd (%p847_p3), [#allocation5], 4294967168 }
 0x2d0   : > { %1133 = dma.done.wait (%p847_p3), [#allocation12], 128  }
 0x2d1   : > { %1135 = vsyncadd (%p847_p3), [#allocation12], 4294967168 }
 0x2d2 PF: > { %s22_s29 = sadd.s32 1, %s1158_s29   ;;  %s1567_s13 = sld [smem:[#allocation18_spill]] }
 0x2d3   : > { %p19_p1 = scmp.ge.s32.totalorder %s22_s29, 6   ;;  %s1568_s24 = smov %s1142_s25 }
 0x2d4   : > { %s1569_s25 = smov %s1146_s26  ;;  %s1570_s26 = smov %s1307_s19 }
 0x2d5   : > { %s1571_s27 = smov %s1154_s28  ;;  %21 = sbr.rel (!%p19_p1) target bundleno = 9 (0x9), region = 118 }
 0x2d8   : > { %s1572_s28 = smov %s1567_s13 }
 0x2dc   :  { %612 = vsyncpa [#allocation4], 1 }
 0x2dd   :  { %614 = vsyncpa [#allocation4 + $0x1], 1 }
 0x2de   :  { %615 = vsyncpa [#allocation7], 1 }
 0x2df   :  { %616 = vsyncpa [#allocation5], 1 }
 0x2e0   :  { %618 = vsyncpa [#allocation5 + $0x1], 1 }
 0x2e1   :  { %619 = vsyncpa [#allocation12], 1 }

</bundles_post_ra>
